<compile_context>
chip_gen: v7x
topology: tpu7x:2x2x1
jax: 0.10.0
libtpu: 0.0.40
codegen_flags: <defaults>
</compile_context>

<pallas_src>
import functools

import jax
import jax.numpy as jnp
from jax.experimental import pallas as pl
from jax.experimental.pallas import tpu as pltpu


def _round_up(n, m):
    return ((n + m - 1) // m) * m


def _param_layout(state_dim, action_dim, lanes):
    """Row offsets of each parameter block inside the packed (rows, lanes) buffer.

    Every block starts on an 8-row (sublane) boundary; `lanes` is the padded
    (lane-dense) feature width, a multiple of 128.
    """
    o_w1s = 0
    o_w1a = o_w1s + _round_up(state_dim, 8)
    o_b1 = o_w1a + _round_up(action_dim, 8)
    o_w2 = o_b1 + 8
    o_b2 = o_w2 + lanes          # w2 contraction dim == padded h1 width
    o_w3 = o_b2 + 8
    o_b3 = o_w3 + 8
    rows = o_b3 + 8
    return dict(lanes=lanes, rows=rows, o_w1s=o_w1s, o_w1a=o_w1a, o_b1=o_b1,
                o_w2=o_w2, o_b2=o_b2, o_w3=o_w3, o_b3=o_b3)


def pack_critic_params(params, state_dim, action_dim):
    """Pack (w1,b1,w2,b2,w3,b3) into one lane-dense f32 buffer (single DMA)."""
    w1, b1, w2, b2, w3, b3 = params
    n_input, nf = w1.shape
    n_output = w3.shape[1]
    assert n_input == state_dim + action_dim
    assert n_output == 1, "critic emits a single Q value"

    lanes = _round_up(nf, 128)
    L = _param_layout(state_dim, action_dim, lanes)

    buf = jnp.zeros((L["rows"], lanes), jnp.float32)
    buf = buf.at[L["o_w1s"]:L["o_w1s"] + state_dim, :nf].set(
        w1[:state_dim].astype(jnp.float32))
    buf = buf.at[L["o_w1a"]:L["o_w1a"] + action_dim, :nf].set(
        w1[state_dim:].astype(jnp.float32))
    buf = buf.at[L["o_b1"]:L["o_b1"] + 1, :nf].set(
        b1.reshape(1, nf).astype(jnp.float32))
    buf = buf.at[L["o_w2"]:L["o_w2"] + nf, :nf].set(w2.astype(jnp.float32))
    buf = buf.at[L["o_b2"]:L["o_b2"] + 1, :nf].set(
        b2.reshape(1, nf).astype(jnp.float32))
    buf = buf.at[L["o_w3"]:L["o_w3"] + 1, :nf].set(
        w3.astype(jnp.float32).reshape(1, nf))          # w3 stored as a row
    buf = buf.at[L["o_b3"]:L["o_b3"] + 1, :].set(
        jnp.broadcast_to(b3.reshape(1, 1).astype(jnp.float32), (1, lanes)))
    return buf


def _critic_kernel(state_ref, action_ref, p_ref, q_ref, *,
                   state_dim, action_dim, layout):
    """Whole forward pass on VMEM-resident tiles (one invocation, grid=())."""
    L = layout
    lanes = L["lanes"]

    s = state_ref[...].astype(jnp.float32)
    a = action_ref[...].astype(jnp.float32)

    w1s = p_ref[pl.ds(L["o_w1s"], state_dim), :]     # (Ds, lanes)
    w1a = p_ref[pl.ds(L["o_w1a"], action_dim), :]    # (Da, lanes)
    b1 = p_ref[pl.ds(L["o_b1"], 1), :]               # (1, lanes)
    w2 = p_ref[pl.ds(L["o_w2"], lanes), :]           # (lanes, lanes)
    b2 = p_ref[pl.ds(L["o_b2"], 1), :]               # (1, lanes)
    w3r = p_ref[pl.ds(L["o_w3"], 1), :]              # (1, lanes)
    b3r = p_ref[pl.ds(L["o_b3"], 1), :]              # (1, lanes), b3 replicated

    # Layer 1: fused concat as a split-K matmul (MXU, f32 accumulation).
    h1 = jnp.dot(s, w1s, preferred_element_type=jnp.float32)
    h1 = h1 + jnp.dot(a, w1a, preferred_element_type=jnp.float32)
    h1 = jnp.maximum(h1 + b1, 0.0)                   # padded lanes stay 0

    # Layer 2.
    h2 = jnp.maximum(
        jnp.dot(h1, w2, preferred_element_type=jnp.float32) + b2, 0.0)

    # Layer 3 (N=1): VPU multiply + cross-lane reduce instead of an MXU matmul.
    q = jnp.sum(h2 * w3r, axis=-1, keepdims=True)    # (B, 1)

    # Lane-dense write: every lane holds q + b3; wrapper reads lane 0.
    q_ref[...] = (jnp.broadcast_to(q, q_ref.shape) + b3r).astype(q_ref.dtype)


@jax.jit
def critic_forward(state, action, packed_params):
    """state:(B,Ds), action:(B,Da), packed_params from pack_critic_params."""
    batch, state_dim = state.shape
    action_dim = action.shape[1]
    lanes = packed_params.shape[1]
    L = _param_layout(state_dim, action_dim, lanes)
    assert packed_params.shape[0] == L["rows"]

    def full(shape):
        return pl.BlockSpec(shape, lambda: (0,) * len(shape),
                            memory_space=pltpu.MemorySpace.VMEM)

    kernel = functools.partial(_critic_kernel, state_dim=state_dim,
                               action_dim=action_dim, layout=L)

    q_pad = pl.pallas_call(
        kernel,
        out_shape=jax.ShapeDtypeStruct((batch, lanes), jnp.float32),
        grid=(),
        in_specs=[
            full((batch, state_dim)),
            full((batch, action_dim)),
            full(packed_params.shape),
        ],
        out_specs=full((batch, lanes)),
    )(state.astype(jnp.float32), action.astype(jnp.float32), packed_params)

    # torch.squeeze(q): n_output == 1 -> (batch,), and a scalar when batch == 1.
    return jnp.squeeze(q_pad[:, :1])


# ----------------------------------------------------------------------------
# Deterministic parameter init (mirrors the PyTorch __init__).
# ----------------------------------------------------------------------------
def _xavier_uniform(key, fan_in, fan_out, gain):
    limit = gain * jnp.sqrt(6.0 / (fan_in + fan_out))
    # stored as (fan_in, fan_out) so the math is x @ W
    return jax.random.uniform(
        key, (fan_in, fan_out), jnp.float32, minval=-limit, maxval=limit)


def _linear_bias(key, fan_in, fan_out):
    # PyTorch nn.Linear default bias init: U(-1/sqrt(fan_in), 1/sqrt(fan_in))
    bound = 1.0 / jnp.sqrt(jnp.float32(fan_in))
    return jax.random.uniform(
        key, (1, fan_out), jnp.float32, minval=-bound, maxval=bound)


def make_critic_params(key, n_input, n_features, n_output):
    relu_gain = jnp.sqrt(2.0)  # nn.init.calculate_gain('relu')
    lin_gain = 1.0             # nn.init.calculate_gain('linear')
    k = jax.random.split(key, 6)
    w1 = _xavier_uniform(k[0], n_input, n_features, relu_gain)
    b1 = _linear_bias(k[1], n_input, n_features)
    w2 = _xavier_uniform(k[2], n_features, n_features, relu_gain)
    b2 = _linear_bias(k[3], n_features, n_features)
    w3 = _xavier_uniform(k[4], n_features, n_output, lin_gain)
    b3 = _linear_bias(k[5], n_features, n_output)
    return (w1, b1, w2, b2, w3, b3)


if __name__ == "__main__":
    key = jax.random.PRNGKey(0)
    k_state, k_action, k_params = jax.random.split(key, 3)

    batch = 8
    state_dim = 24
    action_dim = 8
    n_input = state_dim + action_dim   # input_shape[-1]
    n_features = 32
    n_output = 1                       # output_shape[0]

    state = jax.random.normal(k_state, (batch, state_dim), jnp.float32)
    action = jax.random.normal(k_action, (batch, action_dim), jnp.float32)
    params = make_critic_params(k_params, n_input, n_features, n_output)
    packed = pack_critic_params(params, state_dim, action_dim)

    q = critic_forward(state, action, packed)
    jax.block_until_ready(q)

    # Pure-JAX reference of the PyTorch forward (f32 throughout).
    x = jnp.concatenate([state, action], axis=1)
    w1, b1, w2, b2, w3, b3 = params
    h1 = jnp.maximum(x @ w1 + b1, 0.0)
    h2 = jnp.maximum(h1 @ w2 + b2, 0.0)
    q_expected = jnp.squeeze(h2 @ w3 + b3)

    assert q.shape == (batch,), q.shape
    assert jnp.allclose(q, q_expected, atol=1e-4, rtol=1e-4), \
        float(jnp.max(jnp.abs(q - q_expected)))

    print("KERNEL_OK")
</pallas_src>

<mosaic_0001>
module attributes {stable_mosaic.version = 11 : i64} {
  func.func @_critic_kernel(%arg0: memref<8x24xf32, #tpu.memory_space<vmem>>, %arg1: memref<8x8xf32, #tpu.memory_space<vmem>>, %arg2: memref<192x128xf32, #tpu.memory_space<vmem>>, %arg3: memref<8x128xf32, #tpu.memory_space<vmem>>) attributes {dimension_semantics = [], scalar_prefetch = 0 : i64, scratch_operands = 0 : i64, tpu.core_type = #tpu.core_type<tc>} {
    %c0 = arith.constant 0 : index
    %c0_0 = arith.constant 0 : index
    %0 = vector.load %arg0[%c0, %c0_0] : memref<8x24xf32, #tpu.memory_space<vmem>>, vector<8x24xf32>
    %c0_1 = arith.constant 0 : index
    %c0_2 = arith.constant 0 : index
    %1 = vector.load %arg1[%c0_1, %c0_2] : memref<8x8xf32, #tpu.memory_space<vmem>>, vector<8x8xf32>
    %c0_3 = arith.constant 0 : index
    %c0_4 = arith.constant 0 : index
    %2 = vector.load %arg2[%c0_3, %c0_4] : memref<192x128xf32, #tpu.memory_space<vmem>>, vector<24x128xf32>
    %c24 = arith.constant 24 : index
    %c0_5 = arith.constant 0 : index
    %3 = vector.load %arg2[%c24, %c0_5] : memref<192x128xf32, #tpu.memory_space<vmem>>, vector<8x128xf32>
    %c32 = arith.constant 32 : index
    %c0_6 = arith.constant 0 : index
    %4 = vector.load %arg2[%c32, %c0_6] : memref<192x128xf32, #tpu.memory_space<vmem>>, vector<1x128xf32>
    %c40 = arith.constant 40 : index
    %c0_7 = arith.constant 0 : index
    %5 = vector.load %arg2[%c40, %c0_7] : memref<192x128xf32, #tpu.memory_space<vmem>>, vector<128x128xf32>
    %c168 = arith.constant 168 : index
    %c0_8 = arith.constant 0 : index
    %6 = vector.load %arg2[%c168, %c0_8] : memref<192x128xf32, #tpu.memory_space<vmem>>, vector<1x128xf32>
    %c176 = arith.constant 176 : index
    %c0_9 = arith.constant 0 : index
    %7 = vector.load %arg2[%c176, %c0_9] : memref<192x128xf32, #tpu.memory_space<vmem>>, vector<1x128xf32>
    %c184 = arith.constant 184 : index
    %c0_10 = arith.constant 0 : index
    %8 = vector.load %arg2[%c184, %c0_10] : memref<192x128xf32, #tpu.memory_space<vmem>>, vector<1x128xf32>
    %cst = arith.constant dense<0.000000e+00> : vector<8x128xf32>
    %9 = tpu.matmul %0, %2, %cst {dimension_numbers = #tpu.dot_dimension_numbers<[1], [0], [0], [1], [0, 0, 1, 1], [], []>} : vector<8x24xf32>, vector<24x128xf32>, vector<8x128xf32> -> vector<8x128xf32>
    %cst_11 = arith.constant dense<0.000000e+00> : vector<8x128xf32>
    %10 = tpu.matmul %1, %3, %cst_11 {dimension_numbers = #tpu.dot_dimension_numbers<[1], [0], [0], [1], [0, 0, 1, 1], [], []>} : vector<8x8xf32>, vector<8x128xf32>, vector<8x128xf32> -> vector<8x128xf32>
    %11 = arith.addf %9, %10 : vector<8x128xf32>
    %12 = vector.broadcast %4 : vector<1x128xf32> to vector<8x128xf32>
    %13 = arith.addf %11, %12 : vector<8x128xf32>
    %cst_12 = arith.constant 0.000000e+00 : f32
    %14 = vector.broadcast %cst_12 : f32 to vector<8x128xf32>
    %15 = arith.maximumf %13, %14 : vector<8x128xf32>
    %cst_13 = arith.constant dense<0.000000e+00> : vector<8x128xf32>
    %16 = tpu.matmul %15, %5, %cst_13 {dimension_numbers = #tpu.dot_dimension_numbers<[1], [0], [0], [1], [0, 0, 1, 1], [], []>} : vector<8x128xf32>, vector<128x128xf32>, vector<8x128xf32> -> vector<8x128xf32>
    %17 = vector.broadcast %6 : vector<1x128xf32> to vector<8x128xf32>
    %18 = arith.addf %16, %17 : vector<8x128xf32>
    %cst_14 = arith.constant 0.000000e+00 : f32
    %19 = vector.broadcast %cst_14 : f32 to vector<8x128xf32>
    %20 = arith.maximumf %18, %19 : vector<8x128xf32>
    %21 = vector.broadcast %7 : vector<1x128xf32> to vector<8x128xf32>
    %22 = arith.mulf %20, %21 : vector<8x128xf32>
    %cst_15 = arith.constant dense<0.000000e+00> : vector<8xf32>
    %23 = vector.multi_reduction <add>, %22, %cst_15 [1] : vector<8x128xf32> to vector<8xf32>
    %24 = vector.shape_cast %23 : vector<8xf32> to vector<8x1xf32>
    %25 = vector.shape_cast %24 : vector<8x1xf32> to vector<8x1xf32>
    %26 = vector.broadcast %25 : vector<8x1xf32> to vector<8x128xf32>
    %27 = vector.broadcast %8 : vector<1x128xf32> to vector<8x128xf32>
    %28 = arith.addf %26, %27 : vector<8x128xf32>
    %c0_16 = arith.constant 0 : index
    %c0_17 = arith.constant 0 : index
    %29 = vector.load %arg3[%c0_16, %c0_17] : memref<8x128xf32, #tpu.memory_space<vmem>>, vector<8x128xf32>
    tpu.vector_store %arg3[%c0_16, %c0_17], %28 {strides = array<i32>} : memref<8x128xf32, #tpu.memory_space<vmem>>, vector<8x128xf32>,
    return
  }
}

</mosaic_0001>

<bundles_post_ra>
// kernel: critic_forward.1
= control target key start
LH: loop header
LB: loop body
LE: loop exit
PB: predicated region body
PF: predicated region fallthrough
CT: control target
= control target key end

     0   :  { %8 = vsyncpa [#allocation3], 0  ;;  %s578_s0 = inlined_call_operand.hbm [shape: f32[8,24], index: 0, kind: input, shape index: {}]   ;;  %s579_s1 = inlined_call_operand.hbm [shape: f32[8,8], index: 1, kind: input, shape index: {}]   ;;  %s580_s2 = inlined_call_operand.hbm [shape: f32[192,128], index: 2, kind: input, shape index: {}]   ;;  %s581_s3 = inlined_call_operand.vmem [shape: f32[8,128], index: 3, kind: output, shape index: {}]  }
   0x1   :  { %9 = vsyncpa [#allocation5], 0  ;;  %s508_s12 = smov [#allocation4]   ;;  %s509_s14 = smov [#allocation2]  }
   0x2   :  { %s26_s13 = sshll.u32 %s508_s12, 4  ;;  %s16_s15 = sshll.u32 %s509_s14, 4  ;;  %s27_s13 = int_to_ptr.vmem [resolvable:$true] %s26_s13  ;;  %s17_s15 = int_to_ptr.vmem [resolvable:$true] %s16_s15 }
   0x3   :  { %s438_s18 = scalar_lea.hbm %s579_s1, 128 }
   0x4   :  { %p439_p0 = scmp.ne.s32.totalorder %s579_s1, %s438_s18  ;;  %p442_p1 = scmp.lt.u32.totalorder %s438_s18, %s579_s1 }
   0x6   :  { %p444_p2 = pnand %p442_p1, %p439_p0 }
   0x8   :  { %447 = shalt.err (!%p444_p2)
}
   0x9   :  { %s448_s23 = scalar_lea.vmem %s27_s13, 128  ;;  %p453_p4 = scmp.lt.s32.totalorder %s27_s13, %s27_s13 }
   0xa   :  { %p449_p3 = scmp.ne.s32.totalorder %s27_s13, %s448_s23  ;;  %p454_p5 = scmp.lt.s32.totalorder %s448_s23, %s448_s23 }
   0xc   :  { %p455_p6 = por %p454_p5, %p453_p4 }
   0xe   :  { %p456_p7 = pnand %p455_p6, %p449_p3 }
  0x10   :  { %459 = shalt.err (!%p456_p7)
}
  0x11   :  { %29 = dma.hbm_to_vmem [thread:$0]  %s579_s1, 128, %s27_s13, [#allocation5]  }
  0x12   :  { %s460_s28 = scalar_lea.hbm %s578_s0, 128 }
  0x13   :  { %p461_p8 = scmp.ne.s32.totalorder %s578_s0, %s460_s28  ;;  %p464_p9 = scmp.lt.u32.totalorder %s460_s28, %s578_s0 }
  0x15   :  { %p466_p10 = pnand %p464_p9, %p461_p8 }
  0x17   :  { %469 = shalt.err (!%p466_p10)
}
  0x18   :  { %s470_s6 = scalar_lea.vmem %s17_s15, 128  ;;  %p475_p12 = scmp.lt.s32.totalorder %s17_s15, %s17_s15 }
  0x19   :  { %p471_p11 = scmp.ne.s32.totalorder %s17_s15, %s470_s6  ;;  %p476_p13 = scmp.lt.s32.totalorder %s470_s6, %s470_s6 }
  0x1b   :  { %p477_p0 = por %p476_p13, %p475_p12 }
  0x1d   :  { %p478_p1 = pnand %p477_p0, %p471_p11 }
  0x1f   :  { %481 = shalt.err (!%p478_p1)
}
  0x20   :  { %19 = dma.hbm_to_vmem [thread:$0]  %s578_s0, 128, %s17_s15, [#allocation3]  }
  0x21   :  { %s510_s8 = smov [#allocation6]   ;;  %s482_s12 = scalar_lea.hbm %s580_s2, 3072 }
  0x22   :  { %s35_s9 = sshll.u32 %s510_s8, 4  ;;  %p483_p2 = scmp.ne.s32.totalorder %s580_s2, %s482_s12  ;;  %s36_s9 = int_to_ptr.vmem [resolvable:$true] %s35_s9 }
  0x23   :  { %p486_p3 = scmp.lt.u32.totalorder %s482_s12, %s580_s2 }
  0x25   :  { %p488_p4 = pnand %p486_p3, %p483_p2 }
  0x27   :  { %491 = shalt.err (!%p488_p4)
}
  0x28   :  { %s492_s18 = scalar_lea.vmem %s36_s9, 3072  ;;  %p497_p6 = scmp.lt.s32.totalorder %s36_s9, %s36_s9 }
  0x29   :  { %p493_p5 = scmp.ne.s32.totalorder %s36_s9, %s492_s18  ;;  %p498_p7 = scmp.lt.s32.totalorder %s492_s18, %s492_s18 }
  0x2b   :  { %p499_p8 = por %p498_p7, %p497_p6 }
  0x2d   :  { %p500_p9 = pnand %p499_p8, %p493_p5 }
  0x2f   :  { %503 = shalt.err (!%p500_p9)
}
  0x30   :  { %s511_s0 = smov 128   ;;  %s512_s15 = smov 8  }
  0x31   :  { %41 = dma.hbm_to_vmem [thread:$0]  %s580_s2, 3072, %s36_s9, [#allocation5], %s511_s0, %s511_s0, %s512_s15  }
  0x32   :  { %504 = dma.done.wait [#allocation3], 128  }
  0x33   :  { %505 = vsyncadd [#allocation3], 4294967168 }
  0x34   :  { %506 = dma.done.wait [#allocation5], 3200  }
  0x35   :  { %507 = vsyncadd [#allocation5], 4294964096  ;;  %v513_v0 = vmov 0.0   ;;  %vm514_vm0 = vmmov 0   ;;  %v515_v1 = vmov 0.0|0.0   ;;  %vm77_vm1 = vcmask 64512  }
  0x36   :  { %354 = vmatprep.subr.mxu1 %v513_v0  ;;  %356 = vmatprep.mubr.msk.f32.mxu1 %vm514_vm0, %v513_v0  ;;  %v56_v2 = vld [vmem:[#allocation6 + $0x18] sm:$0xff]  ;;  %v53_v4 = vld [vmem:[#allocation6] sm:$0xff]  ;;  %v54_v5 = vld [vmem:[#allocation6 + $0x8] sm:$0xff]  ;;  %vm151_vm2 = vcmask 195584  }
  0x37   :  { %406 = vmatprep.subr.bf16.mxu0 %v515_v1  ;;  %400 = vmatprep.mubr.msk.f32.mxu0 %vm514_vm0, %v513_v0  ;;  %v52_v3 = vld [vmem:[#allocation4] sm:$0xff]  ;;  %v404_v6 = vpack.c.bf16 %v54_v5, %v53_v4  ;;  %v58_v7 = vld [vmem:[#allocation6 + $0x28] sm:$0xff]  ;;  %v59_v8 = vld [vmem:[#allocation6 + $0x30] sm:$0xff] }
  0x38   :  { %355 = vmatpush3.msra.mxu1 %v56_v2  ;;  %v60_v9 = vld [vmem:[#allocation6 + $0x38] sm:$0xff]  ;;  %v407_v10 = vpack.c.bf16 %v59_v8, %v58_v7  ;;  %v61_v11 = vld [vmem:[#allocation6 + $0x40] sm:$0xff]  ;;  %v55_v12 = vld [vmem:[#allocation6 + $0x10] sm:$0xff] }
  0x39   :  { %357 = vmatmul.mubr.msk.f32.vlgmr.msra.gmra.mrb[0].mxu1 %vm77_vm1, %v52_v3  ;;  %403 = vmatprep.subr.bf16.mxu1 %v515_v1  ;;  %v410_v13 = vpack.c.bf16 %v61_v11, %v60_v9  ;;  %v51_v14 = vld [vmem:[#allocation2] sm:$0xff]  ;;  %v62_v15 = vld [vmem:[#allocation6 + $0x48] sm:$0xff]  ;;  %v64_v18 = vld [vmem:[#allocation6 + $0x58] sm:$0xff] }
  0x3a   :  { %365 = vmatprep.mubr.msk.f32.mxu1 %vm514_vm0, %v513_v0  ;;  %405 = vmatpush3.bf16.msra.mxu1 %v404_v6  ;;  %v63_v16 = vld [vmem:[#allocation6 + $0x50] sm:$0xff]  ;;  %v65_v19 = vld [vmem:[#allocation6 + $0x60] sm:$0xff]  ;;  %v66_v21 = vld [vmem:[#allocation6 + $0x68] sm:$0xff] }
  0x3b   :  { %363 = vmatprep.subr.mxu1 %v513_v0  ;;  %408 = vmatpush3.bf16.msra.mxu0 %v407_v10  ;;  %v413_v17 = vpack.c.bf16 %v63_v16, %v62_v15  ;;  %v416_v20 = vpack.c.bf16 %v65_v19, %v64_v18  ;;  %v67_v22 = vld [vmem:[#allocation6 + $0x70] sm:$0xff]  ;;  %v68_v24 = vld [vmem:[#allocation6 + $0x78] sm:$0xff]  ;;  %v69_v25 = vld [vmem:[#allocation6 + $0x80] sm:$0xff] }
  0x3c   :  { %409 = vmatprep.subr.bf16.mxu0 %v515_v1  ;;  %v419_v23 = vpack.c.bf16 %v67_v22, %v66_v21  ;;  %v422_v26 = vpack.c.bf16 %v69_v25, %v68_v24  ;;  %v70_v27 = vld [vmem:[#allocation6 + $0x88] sm:$0xff]  ;;  %v71_v28 = vld [vmem:[#allocation6 + $0x90] sm:$0xff]  ;;  %v72_v30 = vld [vmem:[#allocation6 + $0x98] sm:$0xff] }
  0x3d   :  { %v425_v29 = vpack.c.bf16 %v71_v28, %v70_v27  ;;  %v73_v31 = vld [vmem:[#allocation6 + $0xa0] sm:$0xff]  ;;  %v328_v41 = vld [vmem:[#allocation6 + $0xa8] ss:$0 sm:$0xff]  ;;  %v329_v45 = vld [vmem:[#allocation6 + $0xb0] ss:$0 sm:$0xff] }
  0x3e   :  { %364 = vmatpush3.msra.mxu1 %v55_v12  ;;  %v428_v32 = vpack.c.bf16 %v73_v31, %v72_v30  ;;  %v327_v35 = vld [vmem:[#allocation6 + $0x20] ss:$0 sm:$0xff]  ;;  %v330_v48 = vld [vmem:[#allocation6 + $0xb8] ss:$0 sm:$0xff] }
  0x3f   :  { %366 = vmatmul.mubr.msk.f32.vlgmr.msra.gmra.mrb[2].mxu1 %vm151_vm2, %v51_v14  ;;  %411 = vmatpush3.bf16.msra.mxu0 %v410_v13 }
  0x40   :  { %412 = vmatprep.subr.bf16.mxu0 %v515_v1 }
  0x43   :  { %414 = vmatpush3.bf16.msra.mxu0 %v413_v17 }
  0x44   :  { %415 = vmatprep.subr.bf16.mxu0 %v515_v1 }
  0x47   :  { %417 = vmatpush3.bf16.msra.mxu0 %v416_v20 }
  0x48   :  { %418 = vmatprep.subr.bf16.mxu0 %v515_v1 }
  0x4b   :  { %420 = vmatpush3.bf16.msra.mxu0 %v419_v23 }
  0x4c   :  { %421 = vmatprep.subr.bf16.mxu0 %v515_v1 }
  0x4f   :  { %423 = vmatpush3.bf16.msra.mxu0 %v422_v26 }
  0x50   :  { %424 = vmatprep.subr.bf16.mxu0 %v515_v1 }
  0x53   :  { %426 = vmatpush3.bf16.msra.mxu0 %v425_v29 }
  0x54   :  { %427 = vmatprep.subr.bf16.mxu0 %v515_v1 }
  0x57   :  { %429 = vmatpush3.bf16.msra.mxu0 %v428_v32 }
 0x10c   :  { %v147_v33 = vpop.f32.mrb[0].mxu1 }
 0x10d   :  { %v358_v34 = vpop.f32.mrb[1].mxu1 }
 0x112   :  { %v221_v36 = vpop.f32.mrb[2].mxu1 }
 0x113   :  { %v222_v37 = vadd.f32 %v221_v36, %v147_v33  ;;  %v367_v38 = vpop.f32.mrb[3].mxu1 }
 0x115   :  { %v229_v39 = vadd.f32 %v327_v35, %v222_v37 }
 0x117   :  { %v230_v40 = vmax.f32 %v229_v39, 0.0 }
 0x119   :  { %401 = vmatmul.mubr.f32.vlgmr.msra.gmra.mrb[0].mxu0 %v230_v40 }
 0x1ec   :  { %v301_v42 = vpop.f32.mrb[0].mxu0 }
 0x1ed   :  { %v302_v43 = vadd.f32 %v328_v41, %v301_v42  ;;  %v402_v44 = vpop.f32.mrb[1].mxu0 }
 0x1ef   :  { %v305_v46 = vmax.f32 %v302_v43, 0.0 }
 0x1f1   :  { %v310_v47 = vmul.f32 %v329_v45, %v305_v46 }
 0x1f3   :  { %311 = vadd.xlane.f32.xlu0 %v310_v47 }
 0x280   :  { %v312_v49 = vpop.xlane.xlu0 %311 }
 0x281   :  { %v317_v50 = vadd.f32 %v330_v48, %v312_v49 }
 0x283   :  { %318 = vst [vmem:[%s581_s3] sm:$0xff] %v317_v50 }
 0x284   :  { %323 = vsyncpa [#allocation3], 1 }
 0x285   :  { %324 = vsyncpa [#allocation5], 1 }

</bundles_post_ra>
